<compile_context>
chip_gen: v5e
topology: v5e:2x2
jax: 0.10.0
libtpu: 0.0.40
codegen_flags: <defaults>
</compile_context>

<pallas_src>
import jax
import jax.numpy as jnp
from jax.experimental import pallas as pl
from jax.experimental.pallas import tpu as pltpu


# ---------------------------------------------------------------------------
# Mish
# ---------------------------------------------------------------------------
def _mish_kernel(x):
    """Mish with reduced EUP pressure (valid only inside a Pallas kernel).

    mish(x) = x * tanh(softplus(x)) = x * n / (n + 2),  n = e^2 + 2e, e = exp(x).
    For x > 20 the ratio is 1 to f32 precision, so fall back to identity
    (also guards exp overflow).  Exact (non-approx) reciprocal: EUP has slack
    and this tightens the end-to-end error.
    """
    x_c = jnp.minimum(x, 20.0)
    e = jnp.exp(x_c)
    n = e * e + 2.0 * e
    y = x * n * pl.reciprocal(n + 2.0, approx=False)
    return jnp.where(x > 20.0, x, y)


def _mish_ref(x):
    """Standard Mish for the pure-JAX reference."""
    return x * jnp.tanh(jax.nn.softplus(x))


# ---------------------------------------------------------------------------
# Kernel
# ---------------------------------------------------------------------------
def _make_kernel(n_blocks):
    def kernel(x_ref, w_in_ref, b_in_ref, w_mid_ref, b_mid_ref,
               w_out_ref, b_out_ref, o_ref):
        # x_ref:     (d_in, tb)                 bf16  (batch on lanes)
        # w_in_ref:  (hidden, d_in)             bf16
        # b_in_ref:  (hidden, 1)                f32
        # w_mid_ref: (2*n_blocks, hidden, hidden) bf16  (torch layout W[out, in])
        # b_mid_ref: (2*n_blocks, hidden, 1)    f32
        # w_out_ref: (d_out, hidden)            bf16
        # b_out_ref: (d_out, 1)                 f32
        # o_ref:     (d_out, tb)                f32

        # Input projection (no activation before it): (hidden, tb) f32.
        h = (jnp.dot(w_in_ref[...], x_ref[...],
                     preferred_element_type=jnp.float32)
             + b_in_ref[...])

        def mid_linear(l, a):
            # y = W_l @ a + b_l -- bf16 MXU operands, f32 accumulation.
            # TODO(synk): bias add broadcasts (hidden,1) over tb lanes per layer;
            # pre-broadcasting would only be free if tb were fixed at 128.
            return (jnp.dot(w_mid_ref[l], a.astype(jnp.bfloat16),
                            preferred_element_type=jnp.float32)
                    + b_mid_ref[l])

        # Pre-activation residual blocks: h <- h + l2(mish(l1(mish(h))))
        for blk in range(n_blocks):
            h_in = h
            t = mid_linear(2 * blk, _mish_kernel(h))
            t = mid_linear(2 * blk + 1, _mish_kernel(t))
            h = t + h_in

        # Output projection on only d_out rows (out activation = Identity).
        out = (jnp.dot(w_out_ref[...], h.astype(jnp.bfloat16),
                       preferred_element_type=jnp.float32)
               + b_out_ref[...])
        o_ref[...] = out.astype(o_ref.dtype)

    return kernel


# ---------------------------------------------------------------------------
# Wrapper
# ---------------------------------------------------------------------------
def _round_up(a, m):
    return (a + m - 1) // m * m


def residual_mlp_pallas(x, w_in, b_in, w_mid, b_mid, w_out, b_out, *, tb=None):
    """Forward pass of ResidualMLP as one Pallas call, tiled over the batch.

    x:      (B, d_in) f32 (batch-major, as torch.nn.Linear expects)
    w_in:   (hidden, d_in)  bf16    b_in:  (hidden, 1) f32
    w_mid:  (2*n_blocks, hidden, hidden) bf16
    b_mid:  (2*n_blocks, hidden, 1) f32
    w_out:  (d_out, hidden) bf16    b_out: (d_out, 1) f32
    returns (B, d_out) f32
    """
    B, d_in = x.shape
    hidden, d_in_w = w_in.shape
    assert d_in_w == d_in
    d_out = w_out.shape[0]
    n_mid = w_mid.shape[0]
    assert n_mid >= 2 and n_mid % 2 == 0
    n_blocks = n_mid // 2

    if tb is None:
        # Multiple of 128 (lane-dense stores, even for tiny B), >=2 grid steps
        # whenever B > 128 (v7x megacore), capped at 1024 lanes so the carried
        # (hidden, tb) f32 residual + Mish temporaries stay spill-safe.
        tb = min(1024, max(128, _round_up((B + 1) // 2, 128)))
    assert tb % 128 == 0
    n_tiles = pl.cdiv(B, tb)
    B_pad = n_tiles * tb

    # Feature-major layout: batch on the lane (last) axis, NO feature padding.
    xT = x.T.astype(jnp.bfloat16)
    if B_pad != B:
        xT = jnp.pad(xT, ((0, 0), (0, B_pad - B)))

    kernel = _make_kernel(n_blocks)

    out_t = pl.pallas_call(
        kernel,
        out_shape=jax.ShapeDtypeStruct((d_out, B_pad), jnp.float32),
        grid_spec=pltpu.PrefetchScalarGridSpec(
            num_scalar_prefetch=0,
            grid=(n_tiles,),
            in_specs=[
                pl.BlockSpec((d_in, tb), lambda i: (0, i)),
                # Weight/bias index maps are constant -> DMA'd once, then
                # VMEM-resident across all grid steps.
                pl.BlockSpec(w_in.shape, lambda i: (0, 0)),
                pl.BlockSpec(b_in.shape, lambda i: (0, 0)),
                pl.BlockSpec(w_mid.shape, lambda i: (0, 0, 0)),
                pl.BlockSpec(b_mid.shape, lambda i: (0, 0, 0)),
                pl.BlockSpec(w_out.shape, lambda i: (0, 0)),
                pl.BlockSpec(b_out.shape, lambda i: (0, 0)),
            ],
            out_specs=pl.BlockSpec((d_out, tb), lambda i: (0, i)),
        ),
        compiler_params=pltpu.CompilerParams(
            dimension_semantics=("parallel",)),
    )(xT, w_in, b_in, w_mid, b_mid, w_out, b_out)

    # Back to batch-major; drop any padded batch columns.
    return out_t[:, :B].T


# ---------------------------------------------------------------------------
# Parameter construction (deterministic, torch.nn.Linear-style init)
# ---------------------------------------------------------------------------
def init_linear_params(key, d_in_l, d_out_l):
    """torch.nn.Linear init: W (out, in), b (out,), uniform +/- 1/sqrt(in)."""
    kw, kb = jax.random.split(key)
    bound = 1.0 / jnp.sqrt(jnp.float32(d_in_l))
    w = jax.random.uniform(kw, (d_out_l, d_in_l), jnp.float32, -bound, bound)
    b = jax.random.uniform(kb, (d_out_l,), jnp.float32, -bound, bound)
    return w, b


def pack_params(layer_params, hidden, d_out, n_blocks):
    """Split per-layer (W, b) into kernel-friendly refs (bf16 weights, f32 biases)."""
    w_in = layer_params[0][0].astype(jnp.bfloat16)
    b_in = layer_params[0][1].reshape(hidden, 1).astype(jnp.float32)
    w_mid = jnp.stack(
        [layer_params[1 + l][0] for l in range(2 * n_blocks)]
    ).astype(jnp.bfloat16)
    b_mid = jnp.stack(
        [layer_params[1 + l][1].reshape(hidden, 1) for l in range(2 * n_blocks)]
    ).astype(jnp.float32)
    w_out = layer_params[-1][0].astype(jnp.bfloat16)
    b_out = layer_params[-1][1].reshape(d_out, 1).astype(jnp.float32)
    return w_in, b_in, w_mid, b_mid, w_out, b_out


def reference_forward(x, layer_params, n_blocks):
    """Pure-JAX f32 reference of the PyTorch forward (standard Mish)."""
    w_in, b_in = layer_params[0]
    w_out, b_out = layer_params[-1]
    h = x @ w_in.T + b_in
    for blk in range(n_blocks):
        w1, b1 = layer_params[1 + 2 * blk]
        w2, b2 = layer_params[2 + 2 * blk]
        h_in = h
        t = _mish_ref(h) @ w1.T + b1
        t = _mish_ref(t) @ w2.T + b2
        h = t + h_in
    return h @ w_out.T + b_out


# ---------------------------------------------------------------------------
# Demo / correctness check
# ---------------------------------------------------------------------------
if __name__ == "__main__":
    # dim_list = [16, 32, 32, 32, 8] -> num_hidden_layers = 2 -> 1 residual block
    dim_list = [16, 32, 32, 32, 8]
    hidden = dim_list[1]
    d_in, d_out = dim_list[0], dim_list[-1]
    n_blocks = (len(dim_list) - 3) // 2
    n_layers = 2 + 2 * n_blocks
    B = 8

    key = jax.random.PRNGKey(0)
    keys = jax.random.split(key, n_layers + 1)

    layer_dims = [(hidden, d_in)] + [(hidden, hidden)] * (2 * n_blocks) + [(d_out, hidden)]
    layer_params = [
        init_linear_params(k, i, o) for k, (o, i) in zip(keys[:n_layers], layer_dims)
    ]

    x = jax.random.normal(keys[-1], (B, d_in), jnp.float32)

    w_in, b_in, w_mid, b_mid, w_out, b_out = pack_params(
        layer_params, hidden, d_out, n_blocks
    )

    out = residual_mlp_pallas(x, w_in, b_in, w_mid, b_mid, w_out, b_out)
    out = jax.block_until_ready(out)

    ref = reference_forward(x, layer_params, n_blocks)
    assert out.shape == (B, d_out)
    # bf16 matmul operands -> relaxed tolerance (Mish reciprocal is exact now).
    max_err = float(jnp.max(jnp.abs(out - ref)))
    assert jnp.allclose(out, ref, atol=3e-2, rtol=3e-2), (
        f"Pallas output mismatch vs reference (max abs err {max_err})"
    )

    print("KERNEL_OK")
</pallas_src>

<mosaic_0001>
module attributes {stable_mosaic.version = 11 : i64} {
  func.func @kernel(%arg0: i32, %arg1: memref<16x128xbf16, #tpu.memory_space<vmem>>, %arg2: memref<32x16xbf16, #tpu.memory_space<vmem>>, %arg3: memref<32x1xf32, #tpu.memory_space<vmem>>, %arg4: memref<2x32x32xbf16, #tpu.memory_space<vmem>>, %arg5: memref<2x32x1xf32, #tpu.memory_space<vmem>>, %arg6: memref<8x32xbf16, #tpu.memory_space<vmem>>, %arg7: memref<8x1xf32, #tpu.memory_space<vmem>>, %arg8: memref<8x128xf32, #tpu.memory_space<vmem>>) attributes {dimension_semantics = [#tpu.dimension_semantics<parallel>], iteration_bounds = array<i64: 1>, scalar_prefetch = 0 : i64, scratch_operands = 0 : i64, tpu.core_type = #tpu.core_type<tc>, window_params = [{transform_indices = @transform_0, window_bounds = array<i64: 16, 128>}, {pipeline_mode = #tpu.pipeline_mode<synchronous>, transform_indices = @transform_1, window_bounds = array<i64: 32, 16>}, {pipeline_mode = #tpu.pipeline_mode<synchronous>, transform_indices = @transform_2, window_bounds = array<i64: 32, 1>}, {pipeline_mode = #tpu.pipeline_mode<synchronous>, transform_indices = @transform_3, window_bounds = array<i64: 2, 32, 32>}, {pipeline_mode = #tpu.pipeline_mode<synchronous>, transform_indices = @transform_4, window_bounds = array<i64: 2, 32, 1>}, {pipeline_mode = #tpu.pipeline_mode<synchronous>, transform_indices = @transform_5, window_bounds = array<i64: 8, 32>}, {pipeline_mode = #tpu.pipeline_mode<synchronous>, transform_indices = @transform_6, window_bounds = array<i64: 8, 1>}, {transform_indices = @transform_7, window_bounds = array<i64: 8, 128>}]} {
    %c0 = arith.constant 0 : index
    %c0_0 = arith.constant 0 : index
    %0 = vector.load %arg2[%c0, %c0_0] : memref<32x16xbf16, #tpu.memory_space<vmem>>, vector<32x16xbf16>
    %c0_1 = arith.constant 0 : index
    %c0_2 = arith.constant 0 : index
    %1 = vector.load %arg1[%c0_1, %c0_2] : memref<16x128xbf16, #tpu.memory_space<vmem>>, vector<16x128xbf16>
    %cst = arith.constant dense<0.000000e+00> : vector<32x128xf32>
    %2 = tpu.matmul %0, %1, %cst {dimension_numbers = #tpu.dot_dimension_numbers<[1], [0], [0], [1], [0, 0, 1, 1], [], []>} : vector<32x16xbf16>, vector<16x128xbf16>, vector<32x128xf32> -> vector<32x128xf32>
    %c0_3 = arith.constant 0 : index
    %c0_4 = arith.constant 0 : index
    %3 = vector.load %arg3[%c0_3, %c0_4] : memref<32x1xf32, #tpu.memory_space<vmem>>, vector<32x1xf32>
    %4 = vector.broadcast %3 : vector<32x1xf32> to vector<32x128xf32>
    %5 = arith.addf %2, %4 : vector<32x128xf32>
    %cst_5 = arith.constant 2.000000e+01 : f32
    %6 = vector.broadcast %cst_5 : f32 to vector<32x128xf32>
    %7 = arith.minimumf %5, %6 : vector<32x128xf32>
    %8 = math.exp %7 : vector<32x128xf32>
    %9 = arith.mulf %8, %8 : vector<32x128xf32>
    %cst_6 = arith.constant 2.000000e+00 : f32
    %10 = vector.broadcast %cst_6 : f32 to vector<32x128xf32>
    %11 = arith.mulf %10, %8 : vector<32x128xf32>
    %12 = arith.addf %9, %11 : vector<32x128xf32>
    %13 = arith.mulf %5, %12 : vector<32x128xf32>
    %cst_7 = arith.constant 2.000000e+00 : f32
    %14 = vector.broadcast %cst_7 : f32 to vector<32x128xf32>
    %15 = arith.addf %12, %14 : vector<32x128xf32>
    %16 = tpu.reciprocal %15 : vector<32x128xf32> -> vector<32x128xf32>
    %17 = arith.mulf %13, %16 : vector<32x128xf32>
    %cst_8 = arith.constant 2.000000e+01 : f32
    %18 = vector.broadcast %cst_8 : f32 to vector<32x128xf32>
    %19 = arith.cmpf ogt, %5, %18 : vector<32x128xf32>
    %20 = arith.select %19, %5, %17 : vector<32x128xi1>, vector<32x128xf32>
    %c0_9 = arith.constant 0 : index
    %c0_10 = arith.constant 0 : index
    %c0_11 = arith.constant 0 : index
    %21 = vector.load %arg4[%c0_9, %c0_10, %c0_11] : memref<2x32x32xbf16, #tpu.memory_space<vmem>>, vector<1x32x32xbf16>
    %22 = vector.shape_cast %21 : vector<1x32x32xbf16> to vector<32x32xbf16>
    %23 = arith.truncf %20 : vector<32x128xf32> to vector<32x128xbf16>
    %cst_12 = arith.constant dense<0.000000e+00> : vector<32x128xf32>
    %24 = tpu.matmul %22, %23, %cst_12 {dimension_numbers = #tpu.dot_dimension_numbers<[1], [0], [0], [1], [0, 0, 1, 1], [], []>} : vector<32x32xbf16>, vector<32x128xbf16>, vector<32x128xf32> -> vector<32x128xf32>
    %c0_13 = arith.constant 0 : index
    %c0_14 = arith.constant 0 : index
    %c0_15 = arith.constant 0 : index
    %25 = vector.load %arg5[%c0_13, %c0_14, %c0_15] : memref<2x32x1xf32, #tpu.memory_space<vmem>>, vector<1x32x1xf32>
    %26 = vector.shape_cast %25 : vector<1x32x1xf32> to vector<32x1xf32>
    %27 = vector.broadcast %26 : vector<32x1xf32> to vector<32x128xf32>
    %28 = arith.addf %24, %27 : vector<32x128xf32>
    %cst_16 = arith.constant 2.000000e+01 : f32
    %29 = vector.broadcast %cst_16 : f32 to vector<32x128xf32>
    %30 = arith.minimumf %28, %29 : vector<32x128xf32>
    %31 = math.exp %30 : vector<32x128xf32>
    %32 = arith.mulf %31, %31 : vector<32x128xf32>
    %cst_17 = arith.constant 2.000000e+00 : f32
    %33 = vector.broadcast %cst_17 : f32 to vector<32x128xf32>
    %34 = arith.mulf %33, %31 : vector<32x128xf32>
    %35 = arith.addf %32, %34 : vector<32x128xf32>
    %36 = arith.mulf %28, %35 : vector<32x128xf32>
    %cst_18 = arith.constant 2.000000e+00 : f32
    %37 = vector.broadcast %cst_18 : f32 to vector<32x128xf32>
    %38 = arith.addf %35, %37 : vector<32x128xf32>
    %39 = tpu.reciprocal %38 : vector<32x128xf32> -> vector<32x128xf32>
    %40 = arith.mulf %36, %39 : vector<32x128xf32>
    %cst_19 = arith.constant 2.000000e+01 : f32
    %41 = vector.broadcast %cst_19 : f32 to vector<32x128xf32>
    %42 = arith.cmpf ogt, %28, %41 : vector<32x128xf32>
    %43 = arith.select %42, %28, %40 : vector<32x128xi1>, vector<32x128xf32>
    %c1 = arith.constant 1 : index
    %c0_20 = arith.constant 0 : index
    %c0_21 = arith.constant 0 : index
    %44 = vector.load %arg4[%c1, %c0_20, %c0_21] : memref<2x32x32xbf16, #tpu.memory_space<vmem>>, vector<1x32x32xbf16>
    %45 = vector.shape_cast %44 : vector<1x32x32xbf16> to vector<32x32xbf16>
    %46 = arith.truncf %43 : vector<32x128xf32> to vector<32x128xbf16>
    %cst_22 = arith.constant dense<0.000000e+00> : vector<32x128xf32>
    %47 = tpu.matmul %45, %46, %cst_22 {dimension_numbers = #tpu.dot_dimension_numbers<[1], [0], [0], [1], [0, 0, 1, 1], [], []>} : vector<32x32xbf16>, vector<32x128xbf16>, vector<32x128xf32> -> vector<32x128xf32>
    %c1_23 = arith.constant 1 : index
    %c0_24 = arith.constant 0 : index
    %c0_25 = arith.constant 0 : index
    %48 = vector.load %arg5[%c1_23, %c0_24, %c0_25] : memref<2x32x1xf32, #tpu.memory_space<vmem>>, vector<1x32x1xf32>
    %49 = vector.shape_cast %48 : vector<1x32x1xf32> to vector<32x1xf32>
    %50 = vector.broadcast %49 : vector<32x1xf32> to vector<32x128xf32>
    %51 = arith.addf %47, %50 : vector<32x128xf32>
    %52 = arith.addf %51, %5 : vector<32x128xf32>
    %c0_26 = arith.constant 0 : index
    %c0_27 = arith.constant 0 : index
    %53 = vector.load %arg6[%c0_26, %c0_27] : memref<8x32xbf16, #tpu.memory_space<vmem>>, vector<8x32xbf16>
    %54 = arith.truncf %52 : vector<32x128xf32> to vector<32x128xbf16>
    %cst_28 = arith.constant dense<0.000000e+00> : vector<8x128xf32>
    %55 = tpu.matmul %53, %54, %cst_28 {dimension_numbers = #tpu.dot_dimension_numbers<[1], [0], [0], [1], [0, 0, 1, 1], [], []>} : vector<8x32xbf16>, vector<32x128xbf16>, vector<8x128xf32> -> vector<8x128xf32>
    %c0_29 = arith.constant 0 : index
    %c0_30 = arith.constant 0 : index
    %56 = vector.load %arg7[%c0_29, %c0_30] : memref<8x1xf32, #tpu.memory_space<vmem>>, vector<8x1xf32>
    %57 = vector.broadcast %56 : vector<8x1xf32> to vector<8x128xf32>
    %58 = arith.addf %55, %57 : vector<8x128xf32>
    %c0_31 = arith.constant 0 : index
    %c0_32 = arith.constant 0 : index
    %59 = vector.load %arg8[%c0_31, %c0_32] : memref<8x128xf32, #tpu.memory_space<vmem>>, vector<8x128xf32>
    tpu.vector_store %arg8[%c0_31, %c0_32], %58 {strides = array<i32>} : memref<8x128xf32, #tpu.memory_space<vmem>>, vector<8x128xf32>,
    return
  }
  func.func @transform_0(%arg0: i32) -> (i32, i32) {
    %c0_i32 = arith.constant 0 : i32
    %c0_i32_0 = arith.constant 0 : i32
    return %c0_i32, %arg0 : i32, i32
  }
  func.func @transform_1(%arg0: i32) -> (i32, i32) {
    %c0_i32 = arith.constant 0 : i32
    %c0_i32_0 = arith.constant 0 : i32
    %c0_i32_1 = arith.constant 0 : i32
    return %c0_i32, %c0_i32_0 : i32, i32
  }
  func.func @transform_2(%arg0: i32) -> (i32, i32) {
    %c0_i32 = arith.constant 0 : i32
    %c0_i32_0 = arith.constant 0 : i32
    %c0_i32_1 = arith.constant 0 : i32
    return %c0_i32, %c0_i32_0 : i32, i32
  }
  func.func @transform_3(%arg0: i32) -> (i32, i32, i32) {
    %c0_i32 = arith.constant 0 : i32
    %c0_i32_0 = arith.constant 0 : i32
    %c0_i32_1 = arith.constant 0 : i32
    %c0_i32_2 = arith.constant 0 : i32
    return %c0_i32, %c0_i32_0, %c0_i32_1 : i32, i32, i32
  }
  func.func @transform_4(%arg0: i32) -> (i32, i32, i32) {
    %c0_i32 = arith.constant 0 : i32
    %c0_i32_0 = arith.constant 0 : i32
    %c0_i32_1 = arith.constant 0 : i32
    %c0_i32_2 = arith.constant 0 : i32
    return %c0_i32, %c0_i32_0, %c0_i32_1 : i32, i32, i32
  }
  func.func @transform_5(%arg0: i32) -> (i32, i32) {
    %c0_i32 = arith.constant 0 : i32
    %c0_i32_0 = arith.constant 0 : i32
    %c0_i32_1 = arith.constant 0 : i32
    return %c0_i32, %c0_i32_0 : i32, i32
  }
  func.func @transform_6(%arg0: i32) -> (i32, i32) {
    %c0_i32 = arith.constant 0 : i32
    %c0_i32_0 = arith.constant 0 : i32
    %c0_i32_1 = arith.constant 0 : i32
    return %c0_i32, %c0_i32_0 : i32, i32
  }
  func.func @transform_7(%arg0: i32) -> (i32, i32) {
    %c0_i32 = arith.constant 0 : i32
    %c0_i32_0 = arith.constant 0 : i32
    return %c0_i32, %arg0 : i32, i32
  }
}

</mosaic_0001>

<bundles_post_ra>
// kernel: tpu_custom_call.1
= control target key start
LH: loop header
LB: loop body
LE: loop exit
PB: predicated region body
PF: predicated region fallthrough
CT: control target
= control target key end

     0   :  { %v592_v2 = vmov 0   ;;  %vm74_vm0 = vcmask 130048   ;;  %s878_s0 = inlined_call_operand.vmem [shape: bf16[16,128], index: 0, kind: input, shape index: {}]   ;;  %s879_s1 = inlined_call_operand.vmem [shape: bf16[32,16], index: 1, kind: input, shape index: {}]   ;;  %s880_s2 = inlined_call_operand.vmem [shape: f32[32,1], index: 2, kind: input, shape index: {}]   ;;  %s881_s3 = inlined_call_operand.vmem [shape: bf16[2,32,32], index: 3, kind: input, shape index: {}]   ;;  %s882_s4 = inlined_call_operand.vmem [shape: f32[2,32,1], index: 4, kind: input, shape index: {}]   ;;  %s883_s5 = inlined_call_operand.vmem [shape: bf16[8,32], index: 5, kind: input, shape index: {}]   ;;  %s884_s6 = inlined_call_operand.vmem [shape: f32[8,1], index: 6, kind: input, shape index: {}]   ;;  %s885_s7 = inlined_call_operand.hbm [shape: f32[8,128], index: 7, kind: output, shape index: {}]  }
   0x1   :  { %v36_v0 = vld [vmem:[%s880_s2 + $0x10] sm:$0xff]  ;;  %v524_v1 = vld [vmem:[%s878_s0] sm:$0xff]  ;;  %531 = vset.pattern.permute.xlu0 %v592_v2  ;;  %532 = vset.pattern.permute.xlu1 %v592_v2 }
   0x2   :  { %v522_v3 = vld [vmem:[%s879_s1] sm:$0xff]  ;;  %50 = vperm.xlu0 %531, %v36_v0   ;;  %88 = vmatpush.bf16.msra.mxu0 %v524_v1 }
   0x3   :  { %v34_v4 = vld [vmem:[%s880_s2] sm:$0xff]  ;;  %533 = vset.pattern.permute.xlu2 %v592_v2 }
   0x4   :  { %40 = vperm.xlu1 %532, %v34_v4  }
   0x5   :  { %12 = vsyncpa [#allocation3], 0  ;;  %491 = vmatmul.msk.bf16.vlgmr.msra.gmra.mxu0 %vm74_vm0, %v522_v3  ;;  %v37_v5 = vld [vmem:[%s880_s2 + $0x18] sm:$0xff]  ;;  %v35_v6 = vld [vmem:[%s880_s2 + $0x8] sm:$0xff]  ;;  %s593_s13 = smov [#allocation2]   ;;  %s470_s17 = sshll.u32 %s885_s7, 4  ;;  %s471_s17 = int_to_ptr.hbm [resolvable:$true] %s470_s17 }
   0x6   :  { %v206_v7 = vld [vmem:[%s882_s4] sm:$0xff]  ;;  %v207_v8 = vld [vmem:[%s882_s4 + $0x8] sm:$0xff]  ;;  %v510_v10 = vld [vmem:[%s882_s4 + $0x38] sm:$0xff]  ;;  %s468_s14 = sshll.u32 %s593_s13, 4  ;;  %s469_s14 = int_to_ptr.vmem [resolvable:$true] %s468_s14 }
   0x7   :  { %v523_v9 = vld [vmem:[%s879_s1 + $0x8] sm:$0xff]  ;;  %v507_v11 = vld [vmem:[%s882_s4 + $0x20] sm:$0xff] }
   0x8   :  { %v440_v12 = vld [vmem:[%s884_s6] sm:$0xff] }
   0xa   :  { %55 = vperm.xlu0 %531, %v37_v5  }
   0xc   :  { %45 = vperm.xlu1 %532, %v35_v6  }
  0x12   :  { %212 = vperm.xlu0 %531, %v206_v7  }
  0x14   :  { %217 = vperm.xlu1 %532, %v207_v8  }
  0x15   :  { %492 = vmatmul.msk.bf16.gmra.mxu0 %vm74_vm0, %v523_v9 }
  0x1a   :  { %395 = vperm.xlu0 %531, %v510_v10  }
  0x1c   :  { %380 = vperm.xlu1 %532, %v507_v11  }
  0x22   :  { %443 = vperm.xlu0 %531, %v440_v12  }
  0x74   :  { %v51_v23 = vpop.permute.xlu0 %50 }
  0x76   :  { %v41_v13 = vpop.permute.xlu1 %40 }
  0x7c   :  { %v56_v34 = vpop.permute.xlu0 %55 }
  0x7e   :  { %v46_v18 = vpop.permute.xlu1 %45 }
  0x82   :  { %v90_v14 = vpop.f32.mrf.mxu0 }
  0x83   :  { %v670_v15 = vadd.f32 %v90_v14, %v41_v13 }
  0x85   :  { %v100_v16 = vmin.f32 %v670_v15, 20.0 }
  0x87   :  { %v104_v17 = vmul.f32 1.442695, %v100_v16 }
  0x89   :  { %534 = vpow2.f32 %v104_v17 }
  0x8a   :  { %v92_v19 = vpop.f32.mrf.mxu0 }
  0x8b   :  { %v673_v20 = vadd.f32 %v92_v19, %v46_v18 }
  0x8d   :  { %v101_v21 = vmin.f32 %v673_v20, 20.0 }
  0x8f   :  { %v106_v22 = vmul.f32 1.442695, %v101_v21  ;;  %v535_v25 = vpop.eup %534 }
  0x90   :  { %v112_v28 = vmul.f32 %v535_v25, %v535_v25  ;;  %v116_v29 = vmul.f32 2.0, %v535_v25 }
  0x91   :  { %536 = vpow2.f32 %v106_v22 }
  0x92   :  { %v95_v24 = vpop.f32.mrf.mxu0  ;;  %v679_v36 = vadd.f32 %v116_v29, %v112_v28 }
  0x93   :  { %v676_v26 = vadd.f32 %v95_v24, %v51_v23 }
  0x94   :  { %v690_v41 = vadd.f32 2.0, %v679_v36 }
  0x95   :  { %v102_v27 = vmin.f32 %v676_v26, 20.0 }
  0x96   :  { %vm137_vm2 = vweird.f32 %v690_v41  ;;  %v141_v8 = vand.u32 2147483647, %v690_v41  ;;  %v143_v17 = vand.u32 2147483648, %v690_v41 }
  0x97   :  { %v537_v30 = vpop.eup %536  ;;  %v108_v31 = vmul.f32 1.442695, %v102_v27 }
  0x98   :  { %v113_v32 = vmul.f32 %v537_v30, %v537_v30  ;;  %v117_v33 = vmul.f32 2.0, %v537_v30  ;;  %vm735_vm12 = vcmp.eq.f32.partialorder %v141_v8, 8.507059e+37 }
  0x99   :  { %538 = vpow2.f32 %v108_v31  ;;  %v208_v31 = vld [vmem:[%s882_s4 + $0x10] sm:$0xff] }
  0x9a   :  { %v97_v35 = vpop.f32.mrf.mxu0  ;;  %v681_v37 = vadd.f32 %v117_v33, %v113_v32  ;;  %222 = vperm.xlu2 %533, %v208_v31  }
  0x9b   :  { %v683_v38 = vadd.f32 %v97_v35, %v56_v34  ;;  %v144_v34 = vor.u32 1.1754944e-38, %v143_v17 }
  0x9c   :  { %v686_v39 = vadd.f32 2.0, %v681_v37  ;;  %v125_v33 = vmul.f32 %v681_v37, %v673_v20 }
  0x9d   :  { %v103_v40 = vmin.f32 %v683_v38, 20.0 }
  0x9e   :  { %540 = vrcp.f32 %v686_v39  ;;  %v155_v9 = vand.u32 2147483647, %v686_v39  ;;  %v157_v10 = vand.u32 2147483648, %v686_v39  ;;  %vm151_vm7 = vweird.f32 %v686_v39 }
  0x9f   :  { %v539_v42 = vpop.eup %538  ;;  %v110_v43 = vmul.f32 1.442695, %v103_v40 }
  0xa0   :  { %v114_v44 = vmul.f32 %v539_v42, %v539_v42  ;;  %v118_v45 = vmul.f32 2.0, %v539_v42  ;;  %vm156_vm13 = vcmp.eq.f32.partialorder %v155_v9, 8.507059e+37  ;;  %v158_v27 = vor.u32 1.1754944e-38, %v157_v10 }
  0xa1   :  { %542 = vpow2.f32 %v110_v43 }
  0xa2   :  { %v122_v46 = vadd.f32 %v118_v45, %v114_v44  ;;  %544 = vrcp.f32 %v690_v41  ;;  %v124_v45 = vmul.f32 %v679_v36, %v670_v15 }
  0xa4   :  { %v130_v47 = vadd.f32 2.0, %v122_v46  ;;  %v694_v48 = vpop.eup %540  ;;  %v126_v28 = vmul.f32 %v122_v46, %v676_v26 }
  0xa5   :  { %v147_v53 = vmul.f32 %v694_v48, %v686_v39  ;;  %vm152_vm4 = vweird.f32 %v694_v48 }
  0xa6   :  { %546 = vrcp.f32 %v130_v47  ;;  %v169_v3 = vand.u32 2147483647, %v130_v47  ;;  %v171_v4 = vand.u32 2147483648, %v130_v47  ;;  %vm165_vm3 = vweird.f32 %v130_v47  ;;  %vm720_vm9 = vmor %vm151_vm7, %vm152_vm4 }
  0xa7   :  { %v543_v49 = vpop.eup %542  ;;  %v148_v59 = vsub.f32 1.0, %v147_v53  ;;  %vm192_vm4 = vcmp.gt.f32.partialorder %v670_v15, 20.0  ;;  %v525_v53 = vld [vmem:[%s881_s3] sm:$0xff] }
  0xa8   :  { %v696_v50 = vpop.eup %544  ;;  %v115_v51 = vmul.f32 %v543_v49, %v543_v49  ;;  %v119_v52 = vmul.f32 2.0, %v543_v49  ;;  %vm170_vm8 = vcmp.eq.f32.partialorder %v169_v3, 8.507059e+37  ;;  %v172_v14 = vor.u32 1.1754944e-38, %v171_v4  ;;  %v209_v49 = vld [vmem:[%s882_s4 + $0x18] sm:$0xff] }
  0xa9   :  { %v133_v55 = vmul.f32 %v696_v50, %v690_v41  ;;  %v149_v63 = vmul.f32 %v694_v48, %v148_v59  ;;  %vm138_vm6 = vweird.f32 %v696_v50  ;;  %227 = vperm.xlu2 %533, %v209_v49  }
  0xaa   :  { %v123_v54 = vadd.f32 %v119_v52, %v115_v51  ;;  %vm731_vm11 = vmor %vm137_vm2, %vm138_vm6  ;;  %vm195_vm2 = vcmp.gt.f32.partialorder %v683_v38, 20.0 }
  0xab   :  { %v134_v61 = vsub.f32 1.0, %v133_v55  ;;  %v150_v6 = vadd.f32 %v694_v48, %v149_v63  ;;  %v508_v55 = vld [vmem:[%s882_s4 + $0x28] sm:$0xff] }
  0xac   :  { %v547_v56 = vpop.eup %546  ;;  %v131_v57 = vadd.f32 2.0, %v123_v54  ;;  %v127_v39 = vmul.f32 %v123_v54, %v683_v38  ;;  %v509_v54 = vld [vmem:[%s882_s4 + $0x30] sm:$0xff] }
  0xad   :  { %v161_v58 = vmul.f32 %v547_v56, %v130_v47  ;;  %vm166_vm1 = vweird.f32 %v547_v56  ;;  %v135_v1 = vmul.f32 %v696_v50, %v134_v61  ;;  %v154_v22 = vsel %vm720_vm9, %v694_v48, %v150_v6 }
  0xae   :  { %548 = vrcp.f32 %v131_v57  ;;  %vm707_vm5 = vmor %vm165_vm3, %vm166_vm1  ;;  %v185_v16 = vand.u32 2147483648, %v131_v57  ;;  %v183_v21 = vand.u32 2147483647, %v131_v57  ;;  %vm179_vm14 = vweird.f32 %v131_v57 }
  0xaf   :  { %v162_v60 = vsub.f32 1.0, %v161_v58  ;;  %v136_v13 = vadd.f32 %v696_v50, %v135_v1  ;;  %v159_v35 = vsel %vm156_vm13, %v158_v27, %v154_v22  ;;  %vm194_vm1 = vcmp.gt.f32.partialorder %v676_v26, 20.0 }
  0xb0   :  { %v186_v32 = vor.u32 1.1754944e-38, %v185_v16  ;;  %vm184_vm0 = vcmp.eq.f32.partialorder %v183_v21, 8.507059e+37  ;;  %v189_v46 = vmul.f32 %v159_v35, %v125_v33  ;;  %vm193_vm3 = vcmp.gt.f32.partialorder %v673_v20, 20.0 }
  0xb1   :  { %v163_v62 = vmul.f32 %v547_v56, %v162_v60  ;;  %v140_v30 = vsel %vm731_vm11, %v696_v50, %v136_v13  ;;  %390 = vperm.xlu2 %533, %v509_v54  }
  0xb2   :  { %v145_v43 = vsel %vm735_vm12, %v144_v34, %v140_v30  ;;  %v197_v51 = vsel %vm193_vm3, %v673_v20, %v189_v46 }
  0xb3   :  { %v164_v0 = vadd.f32 %v547_v56, %v163_v62  ;;  %v188_v48 = vmul.f32 %v145_v43, %v124_v45  ;;  %v218_v62 = vpop.permute.xlu1 %217 }
  0xb4   :  { %v549_v2 = vpop.eup %548 }
  0xb5   :  { %v175_v5 = vmul.f32 %v549_v2, %v131_v57  ;;  %v168_v11 = vsel %vm707_vm5, %v547_v56, %v164_v0  ;;  %vm180_vm10 = vweird.f32 %v549_v2  ;;  %v196_v36 = vsel %vm192_vm4, %v670_v15, %v188_v48  ;;  %v526_v56 = vld [vmem:[%s881_s3 + $0x8] sm:$0xff]  ;;  %v213_v57 = vpop.permute.xlu0 %212 }
  0xb6   :  { %v173_v23 = vsel %vm170_vm8, %v172_v14, %v168_v11  ;;  %vm181_vm15 = vmor %vm179_vm14, %vm180_vm10  ;;  %v204_v52 = vpack.c.bf16 %v197_v51, %v196_v36  ;;  %vm240_vm5 = vcmask 261120  }
  0xb7   :  { %v176_v12 = vsub.f32 1.0, %v175_v5  ;;  %v190_v41 = vmul.f32 %v173_v23, %v126_v28 }
  0xb9   :  { %v177_v19 = vmul.f32 %v549_v2, %v176_v12  ;;  %v198_v37 = vsel %vm194_vm1, %v676_v26, %v190_v41  ;;  %385 = vperm.xlu2 %533, %v508_v55   ;;  %v437_v55 = vld [vmem:[%s883_s5] sm:$0xf] }
  0xbb   :  { %v178_v29 = vadd.f32 %v549_v2, %v177_v19 }
  0xbd   :  { %v182_v40 = vsel %vm181_vm15, %v549_v2, %v178_v29 }
  0xbe   :  { %v187_v42 = vsel %vm184_vm0, %v186_v32, %v182_v40 }
  0xbf   :  { %v191_v44 = vmul.f32 %v187_v42, %v127_v39 }
  0xc1   :  { %v199_v47 = vsel %vm195_vm2, %v683_v38, %v191_v44 }
  0xc2   :  { %v205_v50 = vpack.c.bf16 %v199_v47, %v198_v37 }
  0xc4   :  { %253 = vmatpush.bf16.msra.mxu1 %v205_v50 }
  0xc8   :  { %254 = vmatpush.bf16.msra.mxu1 %v204_v52 }
  0xcb   :  { %501 = vmatmul.msk.bf16.vlgmr.msra.gmra.mxu1 %vm240_vm5, %v525_v53 }
  0xdb   :  { %502 = vmatmul.msk.bf16.gmra.mxu1 %vm240_vm5, %v526_v56 }
  0xf4   :  { %v223_v3 = vpop.permute.xlu2 %222 }
 0x103   :  { %v228_v14 = vpop.permute.xlu2 %227 }
 0x148   :  { %v256_v58 = vpop.f32.mrf.mxu1 }
 0x149   :  { %v778_v59 = vadd.f32 %v256_v58, %v213_v57 }
 0x14b   :  { %v266_v60 = vmin.f32 %v778_v59, 20.0 }
 0x14d   :  { %v270_v61 = vmul.f32 1.442695, %v266_v60 }
 0x14f   :  { %550 = vpow2.f32 %v270_v61 }
 0x150   :  { %v258_v63 = vpop.f32.mrf.mxu1 }
 0x151   :  { %v781_v0 = vadd.f32 %v258_v63, %v218_v62 }
 0x153   :  { %v267_v1 = vmin.f32 %v781_v0, 20.0 }
 0x155   :  { %v272_v2 = vmul.f32 1.442695, %v267_v1  ;;  %v551_v5 = vpop.eup %550 }
 0x156   :  { %v278_v8 = vmul.f32 %v551_v5, %v551_v5  ;;  %v282_v9 = vmul.f32 2.0, %v551_v5 }
 0x157   :  { %552 = vpow2.f32 %v272_v2 }
 0x158   :  { %v261_v4 = vpop.f32.mrf.mxu1  ;;  %v787_v16 = vadd.f32 %v282_v9, %v278_v8 }
 0x159   :  { %v784_v6 = vadd.f32 %v261_v4, %v223_v3 }
 0x15a   :  { %v798_v23 = vadd.f32 2.0, %v787_v16 }
 0x15b   :  { %v268_v7 = vmin.f32 %v784_v6, 20.0 }
 0x15c   :  { %vm303_vm7 = vweird.f32 %v798_v23  ;;  %v307_v56 = vand.u32 2147483647, %v798_v23  ;;  %v309_v2 = vand.u32 2147483648, %v798_v23 }
 0x15d   :  { %v553_v10 = vpop.eup %552  ;;  %v274_v11 = vmul.f32 1.442695, %v268_v7 }
 0x15e   :  { %v279_v12 = vmul.f32 %v553_v10, %v553_v10  ;;  %v283_v13 = vmul.f32 2.0, %v553_v10  ;;  %vm836_vm1 = vcmp.eq.f32.partialorder %v307_v56, 8.507059e+37 }
 0x15f   :  { %554 = vpow2.f32 %v274_v11 }
 0x160   :  { %v789_v17 = vadd.f32 %v283_v13, %v279_v12  ;;  %v263_v18 = vpop.f32.mrf.mxu1 }
 0x161   :  { %v791_v19 = vadd.f32 %v263_v18, %v228_v14 }
 0x162   :  { %v794_v21 = vadd.f32 2.0, %v789_v17  ;;  %v291_v18 = vmul.f32 %v789_v17, %v781_v0 }
 0x163   :  { %v269_v22 = vmin.f32 %v791_v19, 20.0 }
 0x164   :  { %556 = vrcp.f32 %v794_v21  ;;  %v321_v57 = vand.u32 2147483647, %v794_v21  ;;  %v323_v58 = vand.u32 2147483648, %v794_v21  ;;  %vm317_vm12 = vweird.f32 %v794_v21 }
 0x165   :  { %v555_v24 = vpop.eup %554  ;;  %v276_v25 = vmul.f32 1.442695, %v269_v22  ;;  %v310_v22 = vor.u32 1.1754944e-38, %v309_v2 }
 0x166   :  { %v280_v27 = vmul.f32 %v555_v24, %v555_v24  ;;  %v284_v28 = vmul.f32 2.0, %v555_v24  ;;  %vm322_vm2 = vcmp.eq.f32.partialorder %v321_v57, 8.507059e+37  ;;  %v324_v11 = vor.u32 1.1754944e-38, %v323_v58 }
 0x167   :  { %558 = vpow2.f32 %v276_v25 }
 0x168   :  { %560 = vrcp.f32 %v798_v23  ;;  %v288_v29 = vadd.f32 %v284_v28, %v280_v27 }
 0x16a   :  { %v296_v30 = vadd.f32 2.0, %v288_v29  ;;  %v557_v31 = vpop.eup %556  ;;  %v292_v12 = vmul.f32 %v288_v29, %v784_v6 }
 0x16b   :  { %v313_v39 = vmul.f32 %v557_v31, %v794_v21  ;;  %vm318_vm9 = vweird.f32 %v557_v31 }
 0x16c   :  { %562 = vrcp.f32 %v296_v30  ;;  %v335_v36 = vand.u32 2147483647, %v296_v30  ;;  %v337_v52 = vand.u32 2147483648, %v296_v30  ;;  %vm331_vm8 = vweird.f32 %v296_v30  ;;  %vm822_vm14 = vmor %vm317_vm12, %vm318_vm9 }
 0x16d   :  { %v559_v32 = vpop.eup %558  ;;  %v314_v45 = vsub.f32 1.0, %v313_v39  ;;  %vm359_vm9 = vcmp.gt.f32.partialorder %v781_v0, 20.0 }
 0x16e   :  { %v802_v33 = vpop.eup %560  ;;  %v281_v34 = vmul.f32 %v559_v32, %v559_v32  ;;  %v285_v35 = vmul.f32 2.0, %v559_v32  ;;  %vm336_vm13 = vcmp.eq.f32.partialorder %v335_v36, 8.507059e+37  ;;  %v338_v63 = vor.u32 1.1754944e-38, %v337_v52 }
 0x16f   :  { %v299_v41 = vmul.f32 %v802_v33, %v798_v23  ;;  %v315_v48 = vmul.f32 %v557_v31, %v314_v45  ;;  %vm304_vm11 = vweird.f32 %v802_v33 }
 0x170   :  { %v289_v40 = vadd.f32 %v285_v35, %v281_v34  ;;  %vm832_vm0 = vmor %vm303_vm7, %vm304_vm11  ;;  %vm360_vm7 = vcmp.gt.f32.partialorder %v784_v6, 20.0 }
 0x171   :  { %v300_v37 = vsub.f32 1.0, %v299_v41  ;;  %v316_v54 = vadd.f32 %v557_v31, %v315_v48  ;;  %v527_v41 = vld [vmem:[%s881_s3 + $0x10] sm:$0xff]  ;;  %v381_v48 = vpop.permute.xlu1 %380 }
 0x172   :  { %v563_v42 = vpop.eup %562  ;;  %v297_v43 = vadd.f32 2.0, %v289_v40  ;;  %v293_v24 = vmul.f32 %v289_v40, %v791_v19 }
 0x173   :  { %v327_v44 = vmul.f32 %v563_v42, %v296_v30  ;;  %vm332_vm6 = vweird.f32 %v563_v42  ;;  %v301_v50 = vmul.f32 %v802_v33, %v300_v37  ;;  %v320_v7 = vsel %vm822_vm14, %v557_v31, %v316_v54 }
 0x174   :  { %564 = vrcp.f32 %v297_v43  ;;  %vm809_vm10 = vmor %vm331_vm8, %vm332_vm6  ;;  %v351_v1 = vand.u32 2147483648, %v297_v43  ;;  %v349_v5 = vand.u32 2147483647, %v297_v43  ;;  %vm345_vm3 = vweird.f32 %v297_v43 }
 0x175   :  { %v328_v46 = vsub.f32 1.0, %v327_v44  ;;  %v302_v62 = vadd.f32 %v802_v33, %v301_v50  ;;  %v325_v23 = vsel %vm322_vm2, %v324_v11, %v320_v7  ;;  %v290_v30 = vmul.f32 %v787_v16, %v778_v59  ;;  %v396_v44 = vpop.permute.xlu0 %395 }
 0x176   :  { %v352_v21 = vor.u32 1.1754944e-38, %v351_v1  ;;  %vm350_vm6 = vcmp.eq.f32.partialorder %v349_v5, 8.507059e+37  ;;  %v355_v32 = vmul.f32 %v325_v23, %v291_v18  ;;  %vm361_vm8 = vcmp.gt.f32.partialorder %v791_v19, 20.0 }
 0x177   :  { %v329_v47 = vmul.f32 %v563_v42, %v328_v46  ;;  %v306_v14 = vsel %vm832_vm0, %v802_v33, %v302_v62 }
 0x178   :  { %v311_v29 = vsel %vm836_vm1, %v310_v22, %v306_v14  ;;  %v363_v39 = vsel %vm359_vm9, %v781_v0, %v355_v32 }
 0x179   :  { %v330_v49 = vadd.f32 %v563_v42, %v329_v47  ;;  %v354_v34 = vmul.f32 %v311_v29, %v290_v30 }
 0x17a   :  { %v565_v51 = vpop.eup %564 }
 0x17b   :  { %v341_v53 = vmul.f32 %v565_v51, %v297_v43  ;;  %v334_v60 = vsel %vm809_vm10, %v563_v42, %v330_v49  ;;  %vm346_vm15 = vweird.f32 %v565_v51  ;;  %vm358_vm10 = vcmp.gt.f32.partialorder %v778_v59, 20.0  ;;  %v391_v42 = vpop.permute.xlu2 %390 }
 0x17c   :  { %v339_v8 = vsel %vm336_vm13, %v338_v63, %v334_v60  ;;  %vm347_vm4 = vmor %vm345_vm3, %vm346_vm15  ;;  %v362_v16 = vsel %vm358_vm10, %v778_v59, %v354_v34 }
 0x17d   :  { %v342_v61 = vsub.f32 1.0, %v341_v53  ;;  %v356_v27 = vmul.f32 %v339_v8, %v292_v12  ;;  %v371_v40 = vpack.c.bf16 %v363_v39, %v362_v16 }
 0x17f   :  { %v343_v4 = vmul.f32 %v565_v51, %v342_v61  ;;  %v364_v17 = vsel %vm360_vm7, %v784_v6, %v356_v27  ;;  %v528_v6 = vld [vmem:[%s881_s3 + $0x18] sm:$0xff] }
 0x181   :  { %v344_v13 = vadd.f32 %v565_v51, %v343_v4 }
 0x183   :  { %v348_v25 = vsel %vm347_vm4, %v565_v51, %v344_v13  ;;  %v386_v45 = vpop.permute.xlu2 %385 }
 0x184   :  { %v353_v28 = vsel %vm350_vm6, %v352_v21, %v348_v25 }
 0x185   :  { %v357_v31 = vmul.f32 %v353_v28, %v293_v24 }
 0x187   :  { %v365_v33 = vsel %vm361_vm8, %v791_v19, %v357_v31 }
 0x188   :  { %v372_v35 = vpack.c.bf16 %v365_v33, %v364_v17 }
 0x18a   :  { %420 = vmatpush.bf16.msra.mxu2 %v372_v35 }
 0x18e   :  { %421 = vmatpush.bf16.msra.mxu2 %v371_v40 }
 0x191   :  { %519 = vmatmul.msk.bf16.vlgmr.msra.gmra.mxu2 %vm240_vm5, %v527_v41 }
 0x1a1   :  { %520 = vmatmul.msk.bf16.gmra.mxu2 %vm240_vm5, %v528_v6 }
 0x214   :  { %v423_v0 = vpop.f32.mrf.mxu2 }
 0x215   :  { %v424_v49 = vadd.f32 %v423_v0, %v381_v48 }
 0x217   :  { %v433_v53 = vadd.f32 %v424_v49, %v670_v15 }
 0x21c   :  { %v425_v19 = vpop.f32.mrf.mxu2 }
 0x21d   :  { %v426_v37 = vadd.f32 %v425_v19, %v386_v45 }
 0x21f   :  { %v434_v36 = vadd.f32 %v426_v37, %v673_v20 }
 0x221   :  { %v438_v54 = vpack.c.bf16 %v434_v36, %v433_v53 }
 0x224   :  { %v428_v43 = vpop.f32.mrf.mxu2 }
 0x225   :  { %v429_v59 = vadd.f32 %v428_v43, %v391_v42 }
 0x227   :  { %v435_v50 = vadd.f32 %v429_v59, %v676_v26  ;;  %v444_v26 = vpop.permute.xlu0 %443 }
 0x22c   :  { %v430_v46 = vpop.f32.mrf.mxu2 }
 0x22d   :  { %v431_v47 = vadd.f32 %v430_v46, %v396_v44 }
 0x22f   :  { %v436_v51 = vadd.f32 %v431_v47, %v683_v38 }
 0x231   :  { %v439_v52 = vpack.c.bf16 %v436_v51, %v435_v50 }
 0x233   :  { %455 = vmatpush.bf16.msra.mxu3 %v439_v52 }
 0x237   :  { %456 = vmatpush.bf16.msra.mxu3 %v438_v54 }
 0x23a   :  { %521 = vmatmul.msk.bf16.vlgmr.msra.gmra.mxu3 %vm240_vm5, %v437_v55 }
 0x2bd   :  { %v458_v20 = vpop.f32.mrf.mxu3 }
 0x2be   :  { %v459_v38 = vadd.f32 %v458_v20, %v444_v26 }
 0x2c0   :  { %462 = vst [vmem:[#allocation2] sm:$0xff] %v459_v38 }
 0x2c1   :  { %473 = dma.vmem_to_hbm [thread:$0]  %s469_s14, 128, %s471_s17, [#allocation3]  }
 0x2c5   :  { %v460_v15 = vpop.f32.mrf.mxu3 }
 0x2c6   :  { %590 = dma.done.wait [#allocation3], 128  }
 0x2c7   :  { %591 = vsyncadd [#allocation3], 4294967168 }
 0x2c8   :  { %478 = vsyncpa [#allocation3], 1 }

</bundles_post_ra>
